<compile_context>
chip_gen: v7x
topology: tpu7x:2x2x1
jax: 0.10.0
libtpu: 0.0.40
codegen_flags: <defaults>
</compile_context>

<pallas_src>
import functools

import jax
import jax.numpy as jnp
from jax.experimental import pallas as pl
from jax.experimental.pallas import tpu as pltpu


def _round_up(x, m):
    return (x + m - 1) // m * m


# ----------------------------------------------------------------------------
# Kernel body: the whole MLP, layers unrolled, activation never leaves VMEM.
# ----------------------------------------------------------------------------
def _fused_mlp_kernel(*refs, num_layers: int):
    """refs = (x_ref, w0, b0, w1, b1, ..., w_{L-1}, b_{L-1}, o_ref)."""
    x_ref = refs[0]
    o_ref = refs[1 + 2 * num_layers]

    h = x_ref[...]  # bf16 (tm, d0_pad)
    for i in range(num_layers):
        w_ref = refs[1 + 2 * i]  # bf16 (din_pad, dout_pad), VMEM-resident
        b_ref = refs[2 + 2 * i]  # f32  (1, dout_pad)
        # MXU matmul, f32 accumulation.
        y = jnp.dot(h, w_ref[...], preferred_element_type=jnp.float32)
        # Epilogue (bias + ReLU) in f32 on the VPU.
        y = y + b_ref[...]
        if i < num_layers - 1:
            h = jnp.maximum(y, 0.0).astype(jnp.bfloat16)  # next MXU input
        else:
            o_ref[...] = y.astype(o_ref.dtype)


# ----------------------------------------------------------------------------
# One-time parameter preparation (pad + cast once, reuse across forward calls).
# ----------------------------------------------------------------------------
def prepare_mlp_params(params):
    """params: list of (W, b), W (in_dim, out_dim) f32, b (1, out_dim) f32.

    Returns (wb_padded, meta): padded bf16 weights / f32 biases + dim metadata.
    Do this ONCE; re-padding/casting per forward call wastes HBM bandwidth.
    """
    dims_in = [w.shape[0] for w, _ in params]
    dims_out = [w.shape[1] for w, _ in params]
    dpad_in = [_round_up(d, 128) for d in dims_in]
    dpad_out = [_round_up(d, 128) for d in dims_out]

    wb_padded = []
    for li, (w, b) in enumerate(params):
        w_p = jnp.zeros((dpad_in[li], dpad_out[li]), jnp.bfloat16)
        w_p = w_p.at[: w.shape[0], : w.shape[1]].set(w.astype(jnp.bfloat16))
        b_p = jnp.zeros((1, dpad_out[li]), jnp.float32)
        b_p = b_p.at[:, : b.shape[1]].set(b.astype(jnp.float32))
        wb_padded += [w_p, b_p]

    meta = dict(
        num_layers=len(params),
        dims_in=tuple(dims_in), dims_out=tuple(dims_out),
        dpad_in=tuple(dpad_in), dpad_out=tuple(dpad_out),
    )
    return tuple(wb_padded), meta


# ----------------------------------------------------------------------------
# Batch-tile selection: pad the batch UP to the tile, never shrink the tile.
# ----------------------------------------------------------------------------
def _choose_batch_tiling(batch, block_batch=256):
    batch16 = _round_up(batch, 16)          # minimum 16 rows: full bf16 vreg
    if batch16 <= 32:
        tm = batch16                        # one small tile
    elif batch16 <= 2 * block_batch:
        # Two tiles: grid of 2 lets both v7x TensorCores work; the one extra
        # ~0.35us grid step is negligible on single-TC chips (v5e/v6e).
        tm = _round_up(batch16 // 2, 16)
    else:
        tm = block_batch                    # full 256-row tiles for big batch
    n_pad = _round_up(batch16, tm)
    return tm, n_pad


def _vmem_capacity_bytes():
    try:
        return int(pltpu.get_tpu_info().vmem_capacity_bytes)
    except Exception:
        return 64 * 1024 * 1024  # conservative (v7x per-TC) fallback


# ----------------------------------------------------------------------------
# Forward pass: one pallas_call for the whole MLP.
# ----------------------------------------------------------------------------
def mlp_forward(prepared, x, *, block_batch=256, out_dtype=jnp.float32):
    """prepared = prepare_mlp_params(params); x: (batch, input_dim) f32."""
    wb_padded, meta = prepared
    num_layers = meta["num_layers"]
    dpad_in, dpad_out = meta["dpad_in"], meta["dpad_out"]
    batch, input_dim = x.shape
    assert input_dim == meta["dims_in"][0]

    tm, n_pad = _choose_batch_tiling(batch, block_batch)
    grid = (n_pad // tm,)

    # Pad + cast the activation input (zero padding keeps valid rows/cols exact:
    # padded x columns and padded W rows are zero).
    x_p = jnp.zeros((n_pad, dpad_in[0]), jnp.bfloat16)
    x_p = x_p.at[:batch, :input_dim].set(x.astype(jnp.bfloat16))

    # BlockSpecs.
    #   * x / out: tiled over the batch, default double-buffered pipelining.
    #   * W / b: grid-invariant index_map -> resident; single-buffered
    #     (nothing to prefetch), halving their VMEM footprint.
    in_specs = [pl.BlockSpec((tm, dpad_in[0]), lambda i: (i, 0))]
    for li in range(num_layers):
        in_specs.append(
            pl.BlockSpec((dpad_in[li], dpad_out[li]), lambda i: (0, 0),
                         pipeline_mode=pl.Buffered(1)))
        in_specs.append(
            pl.BlockSpec((1, dpad_out[li]), lambda i: (0, 0),
                         pipeline_mode=pl.Buffered(1)))
    out_specs = pl.BlockSpec((tm, dpad_out[-1]), lambda i: (i, 0))

    out_itemsize = jnp.dtype(out_dtype).itemsize

    # Scheduling hint for XLA.
    flops = sum(2 * n_pad * ki * ko for ki, ko in zip(dpad_in, dpad_out))
    bytes_accessed = (
        x_p.size * x_p.dtype.itemsize
        + sum(a.size * a.dtype.itemsize for a in wb_padded)
        + n_pad * dpad_out[-1] * out_itemsize)
    cost = pl.CostEstimate(
        flops=flops, transcendentals=0, bytes_accessed=bytes_accessed)

    # VMEM budget:
    #   resident weights/biases (single-buffered)
    # + double-buffered x tile (bf16) and out tile
    # + intermediate activation scratch: f32 matmul result + bf16 next input.
    resident = sum(a.size * a.dtype.itemsize for a in wb_padded)
    max_feat = max(max(dpad_in), max(dpad_out))
    act_scratch = tm * max(dpad_out) * 4 + tm * max_feat * 2
    per_step = 2 * (tm * dpad_in[0] * 2) + 2 * (tm * dpad_out[-1] * out_itemsize)
    need = resident + per_step + act_scratch

    vmem_cap = _vmem_capacity_bytes()
    headroom = 4 * 1024 * 1024
    vmem_limit = int(min(vmem_cap - headroom,
                         max(16 * 1024 * 1024, int(1.5 * need))))
    # TODO(synk): if resident weights alone exceed ~0.75 * vmem_cap (e.g. several
    # 4096x4096 layers on v7x's 64 MiB VMEM), switch to a weight-streaming path
    # (second grid axis over the widest layer's output dim, or an in-kernel
    # pltpu.emit_pipeline over W blocks left in HBM via memory_space=pl.ANY).

    kernel = functools.partial(_fused_mlp_kernel, num_layers=num_layers)
    out_p = pl.pallas_call(
        kernel,
        out_shape=jax.ShapeDtypeStruct((n_pad, dpad_out[-1]), out_dtype),
        grid=grid,
        in_specs=in_specs,
        out_specs=out_specs,
        compiler_params=pltpu.CompilerParams(
            dimension_semantics=("parallel",),   # batch axis -> megacore / v7x 2 TCs
            vmem_limit_bytes=vmem_limit),
        cost_estimate=cost,
    )(x_p, *wb_padded)

    return out_p[:batch, : meta["dims_out"][-1]]


# ----------------------------------------------------------------------------
# Init + references.
# ----------------------------------------------------------------------------
def init_mlp_params(key, input_dim, hidden_dim, output_dim, num_layers):
    """Deterministic init mirroring nn.Linear shapes.

    PyTorch nn.Linear(n, k) holds weight (k, n); we store W as (n, k) so the
    kernel computes x @ W.
    """
    h = [hidden_dim] * (num_layers - 1)
    dims_in = [input_dim] + h
    dims_out = h + [output_dim]
    params = []
    for li, (n_in, n_out) in enumerate(zip(dims_in, dims_out)):
        kw, kb = jax.random.split(jax.random.fold_in(key, li))
        bound = 1.0 / jnp.sqrt(n_in)
        w = jax.random.uniform(kw, (n_in, n_out), jnp.float32, -bound, bound)
        b = jax.random.uniform(kb, (1, n_out), jnp.float32, -bound, bound)
        params.append((w, b))
    return params


def mlp_reference_f32(params, x):
    """Pure f32 reference of the original PyTorch forward."""
    h = x
    for i, (w, b) in enumerate(params):
        h = jnp.dot(h, w, precision=jax.lax.Precision.HIGHEST) + b
        if i < len(params) - 1:
            h = jnp.maximum(h, 0.0)
    return h


def mlp_reference_bf16(params, x):
    """Mirrors the kernel's numerics: bf16 MXU inputs, f32 accum/epilogue."""
    h = x.astype(jnp.bfloat16)
    out = None
    for i, (w, b) in enumerate(params):
        y = jnp.dot(h.astype(jnp.float32),
                    w.astype(jnp.bfloat16).astype(jnp.float32),
                    precision=jax.lax.Precision.HIGHEST) + b
        if i < len(params) - 1:
            h = jnp.maximum(y, 0.0).astype(jnp.bfloat16)
        else:
            out = y
    return out


if __name__ == "__main__":
    key = jax.random.PRNGKey(0)
    batch = 64
    input_dim = 16
    hidden_dim = 32
    output_dim = 8
    num_layers = 3

    kx, kp = jax.random.split(key)
    x = jax.random.normal(kx, (batch, input_dim), jnp.float32)
    params = init_mlp_params(kp, input_dim, hidden_dim, output_dim, num_layers)

    prepared = prepare_mlp_params(params)            # pad + cast once
    out = jax.block_until_ready(mlp_forward(prepared, x))
    assert out.shape == (batch, output_dim)

    ref_bf16 = mlp_reference_bf16(params, x)   # exact-numerics mirror of the kernel
    ref_f32 = mlp_reference_f32(params, x)     # original module semantics (f32)
    assert jnp.allclose(out, ref_bf16, atol=1e-3, rtol=1e-3), "mismatch vs bf16 reference"
    assert jnp.allclose(out, ref_f32, atol=3e-2, rtol=3e-2), "mismatch vs f32 reference"

    print("KERNEL_OK")
</pallas_src>

<mosaic_0001>
module attributes {stable_mosaic.version = 11 : i64} {
  func.func @_fused_mlp_kernel(%arg0: i32, %arg1: memref<32x128xbf16, #tpu.memory_space<vmem>>, %arg2: memref<128x128xbf16, #tpu.memory_space<vmem>>, %arg3: memref<1x128xf32, #tpu.memory_space<vmem>>, %arg4: memref<128x128xbf16, #tpu.memory_space<vmem>>, %arg5: memref<1x128xf32, #tpu.memory_space<vmem>>, %arg6: memref<128x128xbf16, #tpu.memory_space<vmem>>, %arg7: memref<1x128xf32, #tpu.memory_space<vmem>>, %arg8: memref<32x128xf32, #tpu.memory_space<vmem>>) attributes {dimension_semantics = [#tpu.dimension_semantics<parallel>], iteration_bounds = array<i64: 2>, scalar_prefetch = 0 : i64, scratch_operands = 0 : i64, tpu.core_type = #tpu.core_type<tc>, window_params = [{transform_indices = @transform_0, window_bounds = array<i64: 32, 128>}, {pipeline_mode = #tpu.pipeline_mode<synchronous>, transform_indices = @transform_1, window_bounds = array<i64: 128, 128>}, {pipeline_mode = #tpu.pipeline_mode<synchronous>, transform_indices = @transform_2, window_bounds = array<i64: 1, 128>}, {pipeline_mode = #tpu.pipeline_mode<synchronous>, transform_indices = @transform_3, window_bounds = array<i64: 128, 128>}, {pipeline_mode = #tpu.pipeline_mode<synchronous>, transform_indices = @transform_4, window_bounds = array<i64: 1, 128>}, {pipeline_mode = #tpu.pipeline_mode<synchronous>, transform_indices = @transform_5, window_bounds = array<i64: 128, 128>}, {pipeline_mode = #tpu.pipeline_mode<synchronous>, transform_indices = @transform_6, window_bounds = array<i64: 1, 128>}, {transform_indices = @transform_7, window_bounds = array<i64: 32, 128>}]} {
    %c0 = arith.constant 0 : index
    %c0_0 = arith.constant 0 : index
    %0 = vector.load %arg1[%c0, %c0_0] : memref<32x128xbf16, #tpu.memory_space<vmem>>, vector<32x128xbf16>
    %c0_1 = arith.constant 0 : index
    %c0_2 = arith.constant 0 : index
    %1 = vector.load %arg2[%c0_1, %c0_2] : memref<128x128xbf16, #tpu.memory_space<vmem>>, vector<128x128xbf16>
    %cst = arith.constant dense<0.000000e+00> : vector<32x128xf32>
    %2 = tpu.matmul %0, %1, %cst {dimension_numbers = #tpu.dot_dimension_numbers<[1], [0], [0], [1], [0, 0, 1, 1], [], []>} : vector<32x128xbf16>, vector<128x128xbf16>, vector<32x128xf32> -> vector<32x128xf32>
    %c0_3 = arith.constant 0 : index
    %c0_4 = arith.constant 0 : index
    %3 = vector.load %arg3[%c0_3, %c0_4] : memref<1x128xf32, #tpu.memory_space<vmem>>, vector<1x128xf32>
    %4 = vector.broadcast %3 : vector<1x128xf32> to vector<32x128xf32>
    %5 = arith.addf %2, %4 : vector<32x128xf32>
    %cst_5 = arith.constant 0.000000e+00 : f32
    %6 = vector.broadcast %cst_5 : f32 to vector<32x128xf32>
    %7 = arith.maximumf %5, %6 : vector<32x128xf32>
    %8 = arith.truncf %7 : vector<32x128xf32> to vector<32x128xbf16>
    %c0_6 = arith.constant 0 : index
    %c0_7 = arith.constant 0 : index
    %9 = vector.load %arg4[%c0_6, %c0_7] : memref<128x128xbf16, #tpu.memory_space<vmem>>, vector<128x128xbf16>
    %cst_8 = arith.constant dense<0.000000e+00> : vector<32x128xf32>
    %10 = tpu.matmul %8, %9, %cst_8 {dimension_numbers = #tpu.dot_dimension_numbers<[1], [0], [0], [1], [0, 0, 1, 1], [], []>} : vector<32x128xbf16>, vector<128x128xbf16>, vector<32x128xf32> -> vector<32x128xf32>
    %c0_9 = arith.constant 0 : index
    %c0_10 = arith.constant 0 : index
    %11 = vector.load %arg5[%c0_9, %c0_10] : memref<1x128xf32, #tpu.memory_space<vmem>>, vector<1x128xf32>
    %12 = vector.broadcast %11 : vector<1x128xf32> to vector<32x128xf32>
    %13 = arith.addf %10, %12 : vector<32x128xf32>
    %cst_11 = arith.constant 0.000000e+00 : f32
    %14 = vector.broadcast %cst_11 : f32 to vector<32x128xf32>
    %15 = arith.maximumf %13, %14 : vector<32x128xf32>
    %16 = arith.truncf %15 : vector<32x128xf32> to vector<32x128xbf16>
    %c0_12 = arith.constant 0 : index
    %c0_13 = arith.constant 0 : index
    %17 = vector.load %arg6[%c0_12, %c0_13] : memref<128x128xbf16, #tpu.memory_space<vmem>>, vector<128x128xbf16>
    %cst_14 = arith.constant dense<0.000000e+00> : vector<32x128xf32>
    %18 = tpu.matmul %16, %17, %cst_14 {dimension_numbers = #tpu.dot_dimension_numbers<[1], [0], [0], [1], [0, 0, 1, 1], [], []>} : vector<32x128xbf16>, vector<128x128xbf16>, vector<32x128xf32> -> vector<32x128xf32>
    %c0_15 = arith.constant 0 : index
    %c0_16 = arith.constant 0 : index
    %19 = vector.load %arg7[%c0_15, %c0_16] : memref<1x128xf32, #tpu.memory_space<vmem>>, vector<1x128xf32>
    %20 = vector.broadcast %19 : vector<1x128xf32> to vector<32x128xf32>
    %21 = arith.addf %18, %20 : vector<32x128xf32>
    %c0_17 = arith.constant 0 : index
    %c0_18 = arith.constant 0 : index
    %22 = vector.load %arg8[%c0_17, %c0_18] : memref<32x128xf32, #tpu.memory_space<vmem>>, vector<32x128xf32>
    tpu.vector_store %arg8[%c0_17, %c0_18], %21 {strides = array<i32>} : memref<32x128xf32, #tpu.memory_space<vmem>>, vector<32x128xf32>,
    return
  }
  func.func @transform_0(%arg0: i32) -> (i32, i32) {
    %c0_i32 = arith.constant 0 : i32
    %c0_i32_0 = arith.constant 0 : i32
    return %arg0, %c0_i32 : i32, i32
  }
  func.func @transform_1(%arg0: i32) -> (i32, i32) {
    %c0_i32 = arith.constant 0 : i32
    %c0_i32_0 = arith.constant 0 : i32
    %c0_i32_1 = arith.constant 0 : i32
    return %c0_i32, %c0_i32_0 : i32, i32
  }
  func.func @transform_2(%arg0: i32) -> (i32, i32) {
    %c0_i32 = arith.constant 0 : i32
    %c0_i32_0 = arith.constant 0 : i32
    %c0_i32_1 = arith.constant 0 : i32
    return %c0_i32, %c0_i32_0 : i32, i32
  }
  func.func @transform_3(%arg0: i32) -> (i32, i32) {
    %c0_i32 = arith.constant 0 : i32
    %c0_i32_0 = arith.constant 0 : i32
    %c0_i32_1 = arith.constant 0 : i32
    return %c0_i32, %c0_i32_0 : i32, i32
  }
  func.func @transform_4(%arg0: i32) -> (i32, i32) {
    %c0_i32 = arith.constant 0 : i32
    %c0_i32_0 = arith.constant 0 : i32
    %c0_i32_1 = arith.constant 0 : i32
    return %c0_i32, %c0_i32_0 : i32, i32
  }
  func.func @transform_5(%arg0: i32) -> (i32, i32) {
    %c0_i32 = arith.constant 0 : i32
    %c0_i32_0 = arith.constant 0 : i32
    %c0_i32_1 = arith.constant 0 : i32
    return %c0_i32, %c0_i32_0 : i32, i32
  }
  func.func @transform_6(%arg0: i32) -> (i32, i32) {
    %c0_i32 = arith.constant 0 : i32
    %c0_i32_0 = arith.constant 0 : i32
    %c0_i32_1 = arith.constant 0 : i32
    return %c0_i32, %c0_i32_0 : i32, i32
  }
  func.func @transform_7(%arg0: i32) -> (i32, i32) {
    %c0_i32 = arith.constant 0 : i32
    %c0_i32_0 = arith.constant 0 : i32
    return %arg0, %c0_i32 : i32, i32
  }
}

</mosaic_0001>

<bundles_post_ra>
// kernel: tpu_custom_call.1
= control target key start
LH: loop header
LB: loop body
LE: loop exit
PB: predicated region body
PF: predicated region fallthrough
CT: control target
= control target key end

     0   :  { %12 = vsyncpa [#allocation3], 0  ;;  %s1624_s0 = inlined_call_operand.hbm [shape: bf16[64,128], index: 0, kind: input, shape index: {}]   ;;  %s1625_s1 = inlined_call_operand.hbm [shape: bf16[128,128], index: 1, kind: input, shape index: {}]   ;;  %s1626_s2 = inlined_call_operand.vmem [shape: f32[1,128], index: 2, kind: input, shape index: {}]   ;;  %s1627_s3 = inlined_call_operand.hbm [shape: bf16[128,128], index: 3, kind: input, shape index: {}]   ;;  %s1628_s4 = inlined_call_operand.vmem [shape: f32[1,128], index: 4, kind: input, shape index: {}]   ;;  %s1629_s5 = inlined_call_operand.hbm [shape: bf16[128,128], index: 5, kind: input, shape index: {}]   ;;  %s1630_s6 = inlined_call_operand.vmem [shape: f32[1,128], index: 6, kind: input, shape index: {}]   ;;  %s1631_s7 = inlined_call_operand.hbm [shape: f32[64,128], index: 7, kind: output, shape index: {}]  }
   0x1   :  { %14 = vsyncpa [#allocation3 + $0x1], 0 }
   0x2   :  { %15 = vsyncpa [#allocation6], 0 }
   0x3   :  { %16 = vsyncpa [#allocation9], 0 }
   0x4   :  { %17 = vsyncpa [#allocation4], 0 }
   0x5   :  { %19 = vsyncpa [#allocation4 + $0x1], 0  ;;  %s1339_s24 = smov 0   ;;  %s1341_s25 = smov 0  }
   0x6   :  { %s1343_s26 = smov 0   ;;  %s1345_s27 = smov 0  }
   0x7 LB: > { %s1360_s28 = sadd.s32 4294967295, %s1288_s27   ;;  %s852_s29 = sadd.s32 4294967294, %s1288_s27   ;;  %s1288_s27 = sphi %s1345_s27, %s1657_s27   ;;  %s1284_s26 = sphi %s1343_s26, %s1656_s26   ;;  %s1280_s25 = sphi %s1341_s25, %s1655_s25   ;;  %s1276_s24 = sphi %s1339_s24, %s1654_s24  }
   0x8   : > { %p45_p0 = scmp.ne.s32.totalorder %s1280_s25, %s1276_s24  ;;  %p1632_p1 = scmp.eq.s32.totalorder %s1360_s28, 0 }
   0x9   : > { %p201_p3 = scmp.eq.s32.totalorder %s852_s29, 1  ;;  %p853_p5 = scmp.ge.s32.totalorder %s1288_s27, 1 }
   0xa   : > { %p1369_p4 = por %p1632_p1, %p45_p0  ;;  %p208_p7 = scmp.lt.s32.totalorder %s1288_s27, 3 }
   0xb   : > { %p1374_p6 = por %p201_p3, %p45_p0  ;;  %s1290_s10 = smov [#allocation5]  }
   0xc   : > { %s1636_s30 = scalar_select %p1369_p4, 1, 0 }
   0xd   : > { %s1637_s8 = scalar_select %p1374_p6, 1, 0 }
   0xe   : > { %p1379_p8 = pnand %p853_p5, %p208_p7  ;;  %s220_s11 = sshll.u32 %s1290_s10, 4  ;;  %s1383_s11 = int_to_ptr.vmem [resolvable:$true] %s220_s11 }
   0xf   : > { %1638 = sst [smem:[#allocation15_spill]] %s1637_s8  ;;  %s1291_s13 = smov [#allocation7]  }
  0x10   : > { %s1639_s9 = scalar_select %p1379_p8, 1, 0 }
  0x11   : > { %p1009_p9 = pneg %p1379_p8  ;;  %s236_s14 = sshll.u32 %s1291_s13, 4  ;;  %s1394_s14 = int_to_ptr.vmem [resolvable:$true] %s236_s14 }
  0x12   : > { %s1292_s15 = smov [#allocation8]   ;;  %s1100_s19 = scalar_lea.hbm %s1625_s1, 1024 }
  0x13   : > { %p1390_p11 = pnand %p1009_p9, %p1632_p1  ;;  %s1396_s16 = sshll.u32 %s1292_s15, 4  ;;  %s253_s16 = int_to_ptr.vmem [resolvable:$true] %s1396_s16 }
  0x14   : > { %p1101_p12 = scmp.ne.s32.totalorder %s1625_s1, %s1100_s19  ;;  %p1107_p5 = scmp.lt.u32.totalorder %s1100_s19, %s1625_s1 }
  0x15   : > { %p1406_p13 = pneg %p1390_p11 }
  0x17   : > { %p1103_p0 = pnand %p1406_p13, %p1101_p12 }
  0x19   : > { %p1104_p3 = pneg %p1103_p0 }
  0x1b   : > { %p1109_p7 = pnand %p1107_p5, %p1104_p3 }
  0x1d   : > { %1112 = shalt.err (!%p1109_p7)
}
  0x1e   : > { %s1113_s10 = scalar_lea.vmem %s1383_s11, 1024  ;;  %p1121_p2 = scmp.lt.s32.totalorder %s1383_s11, %s1383_s11 }
  0x1f   : > { %p1114_p9 = scmp.ne.s32.totalorder %s1383_s11, %s1113_s10  ;;  %p1122_p6 = scmp.lt.s32.totalorder %s1113_s10, %s1113_s10 }
  0x21   : > { %p1116_p10 = pnand %p1114_p9, %p1406_p13  ;;  %p1123_p12 = por %p1122_p6, %p1121_p2 }
  0x23   : > { %p1117_p1 = pneg %p1116_p10 }
  0x25   : > { %p1124_p0 = pnand %p1123_p12, %p1117_p1 }
  0x27   : > { %1127 = shalt.err (!%p1124_p0)
}
  0x28   : > { %s1293_s13 = smov 64   ;;  %s1294_s15 = smov 4  }
  0x29   : > { %1012 = dma.hbm_to_vmem [thread:$0]  (!%p1390_p11), %s1625_s1, 1024, %s1383_s11, [#allocation6], %s1293_s13, %s1293_s13, %s1294_s15  }
  0x2a   : > { %s1128_s21 = scalar_lea.hbm %s1627_s3, 1024 }
  0x2b   : > { %p1129_p1 = scmp.ne.s32.totalorder %s1627_s3, %s1128_s21  ;;  %p1135_p10 = scmp.lt.u32.totalorder %s1128_s21, %s1627_s3 }
  0x2d   : > { %p1131_p2 = pnand %p1129_p1, %p1406_p13 }
  0x2f   : > { %p1132_p6 = pneg %p1131_p2 }
  0x31   : > { %p1137_p3 = pnand %p1135_p10, %p1132_p6 }
  0x33   : > { %1140 = shalt.err (!%p1137_p3)
}
  0x34   : > { %s1141_s11 = scalar_lea.vmem %s1394_s14, 1024  ;;  %p1149_p12 = scmp.lt.s32.totalorder %s1394_s14, %s1394_s14 }
  0x35   : > { %p1142_p5 = scmp.ne.s32.totalorder %s1394_s14, %s1141_s11  ;;  %p1150_p0 = scmp.lt.s32.totalorder %s1141_s11, %s1141_s11 }
  0x37   : > { %p1144_p7 = pnand %p1142_p5, %p1406_p13  ;;  %p1151_p1 = por %p1150_p0, %p1149_p12 }
  0x39   : > { %p1145_p9 = pneg %p1144_p7 }
  0x3b   : > { %p1152_p2 = pnand %p1151_p1, %p1145_p9 }
  0x3d   : > { %1155 = shalt.err (!%p1152_p2)
}
  0x3e   : > { %1015 = dma.hbm_to_vmem [thread:$0]  (!%p1390_p11), %s1627_s3, 1024, %s1394_s14, [#allocation6], %s1293_s13, %s1293_s13, %s1294_s15  }
  0x3f   : > { %s1156_s20 = scalar_lea.hbm %s1629_s5, 1024 }
  0x40   : > { %p1157_p6 = scmp.ne.s32.totalorder %s1629_s5, %s1156_s20  ;;  %p1163_p5 = scmp.lt.u32.totalorder %s1156_s20, %s1629_s5 }
  0x42   : > { %p1159_p10 = pnand %p1157_p6, %p1406_p13 }
  0x44   : > { %p1160_p3 = pneg %p1159_p10 }
  0x46   : > { %p1165_p7 = pnand %p1163_p5, %p1160_p3 }
  0x48   : > { %1168 = shalt.err (!%p1165_p7)
}
  0x49   : > { %s1169_s11 = scalar_lea.vmem %s253_s16, 1024  ;;  %p1177_p1 = scmp.lt.s32.totalorder %s253_s16, %s253_s16 }
  0x4a   : > { %p1170_p9 = scmp.ne.s32.totalorder %s253_s16, %s1169_s11  ;;  %p1178_p2 = scmp.lt.s32.totalorder %s1169_s11, %s1169_s11 }
  0x4c   : > { %p1172_p12 = pnand %p1170_p9, %p1406_p13  ;;  %p1179_p4 = por %p1178_p2, %p1177_p1 }
  0x4e   : > { %p1173_p0 = pneg %p1172_p12 }
  0x50   : > { %p1180_p8 = pnand %p1179_p4, %p1173_p0 }
  0x52   : > { %1183 = shalt.err (!%p1180_p8)
}
  0x53   : > { %1018 = dma.hbm_to_vmem [thread:$0]  (!%p1390_p11), %s1629_s5, 1024, %s253_s16, [#allocation9], %s1293_s13, %s1293_s13, %s1294_s15  }
  0x54   : > { %s1479_s22 = sadd.s32 1, %s1288_s27   ;;  %s32_s17 = sadd.s32 1, %s1284_s26 }
  0x55   : > { %s29_s12 = ssub.s32 %s1288_s27, %s1479_s22  ;;  %p39_p8 = scmp.ne.s32.totalorder %s1284_s26, %s1280_s25 }
  0x56   : > { %p30_p4 = scmp.eq.s32.totalorder %s29_s12, 0  ;;  %p40_p13 = scmp.eq.s32.totalorder %s1288_s27, 0 }
  0x57   : > { %p1030_p6 = scmp.lt.s32.totalorder %s1288_s27, 2  ;;  %p1642_p3 = scmp.eq.s32.totalorder %s1360_s28, 1 }
  0x58   : > { %s1489_s18 = scalar_select %p30_p4, %s1284_s26, %s32_s17  }
  0x59   : > { %p41_p10 = por %p40_p13, %p39_p8  ;;  %p1493_p5 = por %p1642_p3, %p39_p8 }
  0x5a   : > { %s269_s20 = sand.u32 1, %s1284_s26   ;;  %s901_s21 = sshll.u32 %s1288_s27, 8 }
  0x5b   : > { %s858_s16 = sshll.u32 %s269_s20, 4  ;;  %s1502_s10 = scalar_lea.hbm %s1624_s0, %s901_s21 }
  0x5c   : > { %s273_s11 = scalar_lea.vmem [#allocation2], %s858_s16  ;;  %p1504_p11 = pnand %p1030_p6, %p41_p10 }
  0x5d   : > { %s280_s14 = sshll.u32 %s273_s11, 4  ;;  %s1510_s12 = scalar_lea.sflag [#allocation3], %s269_s20  ;;  %s1508_s14 = int_to_ptr.vmem [resolvable:$true] %s280_s14 }
  0x5e   : > { %s1184_s17 = scalar_lea.hbm %s1502_s10, 256  ;;  %p1186_p9 = pneg %p1504_p11 }
  0x5f   : > { %p1185_p7 = scmp.ne.s32.totalorder %s1502_s10, %s1184_s17  ;;  %s1189_s23 = scalar_lea.hbm %s1624_s0, 512 }
  0x60   : > { %p1190_p1 = scmp.lt.u32.totalorder %s1502_s10, %s1624_s0  ;;  %p1191_p2 = scmp.lt.u32.totalorder %s1189_s23, %s1184_s17 }
  0x61   : > { %p1187_p12 = pnand %p1186_p9, %p1185_p7  ;;  %p1193_p8 = scmp.lt.u32.totalorder %s1184_s17, %s1502_s10 }
  0x62   : > { %p1192_p4 = por %p1191_p2, %p1190_p1 }
  0x63   : > { %p1188_p0 = pneg %p1187_p12 }
  0x64   : > { %p1194_p13 = por %p1193_p8, %p1192_p4 }
  0x66   : > { %p1195_p6 = pnand %p1194_p13, %p1188_p0 }
  0x68   : > { %1198 = shalt.err (!%p1195_p6)
}
  0x69   : > { %s1199_s20 = scalar_lea.vmem %s1508_s14, 256  ;;  %s1295_s21 = smov [#allocation2]  }
  0x6a   : > { %p1200_p10 = scmp.ne.s32.totalorder %s1508_s14, %s1199_s20  ;;  %s1204_s16 = sshll.u32 %s1295_s21, 4  ;;  %s1205_s16 = int_to_ptr.vmem [resolvable:$false] %s1204_s16 }
  0x6b   : > { %s1206_s29 = scalar_lea.vmem %s1205_s16, 512  ;;  %p1207_p12 = scmp.lt.s32.totalorder %s1508_s14, %s1205_s16 }
  0x6c   : > { %p1202_p3 = pnand %p1200_p10, %p1186_p9  ;;  %p1208_p1 = scmp.lt.s32.totalorder %s1206_s29, %s1199_s20 }
  0x6e   : > { %p1203_p7 = pneg %p1202_p3  ;;  %p1209_p2 = por %p1208_p1, %p1207_p12 }
  0x70   : > { %p1210_p4 = pnand %p1209_p2, %p1203_p7 }
  0x72   : > { %1213 = shalt.err (!%p1210_p4)
}
  0x73   : > { %1022 = dma.hbm_to_vmem [thread:$0]  (!%p1504_p11), %s1502_s10, 256, %s1508_s14, %s1510_s12, %s1293_s13, %s1293_s13, %s1294_s15  }
  0x74   : > { %p1645_p9 = scmp.ne.s32.totalorder %s1639_s9, 0 }
  0x75   : > { %s1544_s17 = sand.u32 (!%p1645_p9), 1, %s1280_s25   ;;  %p1646_p0 = scmp.ne.s32.totalorder (!%p1645_p9), %s1636_s30, 0 }
  0x76   : > { %292 = sbr.rel (%p1645_p9) target bundleno = 842 (0x34a), region = 48  ;;  %s862_s23 = sshll.u32 (!%p1645_p9), %s1544_s17, 4 }
  0x77   : > { %s295_s11 = scalar_lea.sflag (!%p1645_p9), [#allocation3], %s1544_s17  ;;  %s1548_s20 = scalar_lea.vmem (!%p1645_p9), [#allocation2], %s862_s23 }
  0x7d   : > { %1259 = dma.done.wait (%p1646_p0), %s295_s11, 256  }
  0x7e   : > { %1261 = vsyncadd (%p1646_p0), %s295_s11, 4294967040  ;;  %p1647_p11 = scmp.eq.s32.totalorder %s1360_s28, 0 }
  0x80   : > { %1263 = dma.done.wait (%p1647_p11), [#allocation6], 2048   ;;  %p1648_p8 = pmov %p1647_p11 }
  0x82   : > { %1265 = vsyncadd (%p1648_p8), [#allocation6], 4294965248  ;;  %p1649_p13 = pmov %p1648_p8 }
  0x83   : > { %p1650_p6 = pmov %p1648_p8 }
  0x84   : > { %1267 = dma.done.wait (%p1649_p13), [#allocation9], 1024  }
  0x85   : > { %1269 = vsyncadd (%p1650_p6), [#allocation9], 4294966272  ;;  %v1074_v0 = vld [vmem:[#allocation5] sm:$0xff]   ;;  %v1075_v1 = vld [vmem:[#allocation5 + $0x8] sm:$0xff]   ;;  %s866_s10 = sshll.u32 %s1544_s17, 5  ;;  %s902_s16 = sshll.u32 %s1360_s28, 9 }
  0x86   : > { %933 = vmatprep.subr.bf16.mxu0 %v1074_v0  ;;  %v1076_v2 = vld [vmem:[#allocation5 + $0x10] sm:$0xff]   ;;  %v1077_v3 = vld [vmem:[#allocation5 + $0x18] sm:$0xff]   ;;  %v1084_v5 = vld [vmem:[#allocation7] sm:$0xff]   ;;  %s340_s12 = scalar_lea.vmem [#allocation10], %s866_s10  ;;  %s1580_s11 = scalar_lea.hbm %s1631_s7, %s902_s16 }
  0x87   : > { %934 = vmatpush3.bf16.msra.mxu0 %v1074_v0  ;;  %v1082_v4 = vld [vmem:[%s1548_s20] sm:$0xff]   ;;  %v1085_v6 = vld [vmem:[#allocation7 + $0x8] sm:$0xff]   ;;  %953 = vmatprep.subr.bf16.mxu1 %v1084_v5  ;;  %v1087_v10 = vld [vmem:[#allocation7 + $0x18] sm:$0xff]   ;;  %s750_s21 = sshll.u32 %s340_s12, 4  ;;  %s737_s28 = scalar_lea.sflag [#allocation4], %s1544_s17  ;;  %s1575_s21 = int_to_ptr.vmem [resolvable:$true] %s750_s21 }
  0x88   : > { %935 = vmatprep.subr.bf16.mxu0 %v1075_v1  ;;  %949 = vmatprep.mubr.bf16.mxu0 %v1082_v4  ;;  %v1078_v7 = vld [vmem:[#allocation5 + $0x20] sm:$0xff]   ;;  %v1086_v8 = vld [vmem:[#allocation7 + $0x10] sm:$0xff]   ;;  %v1079_v9 = vld [vmem:[#allocation5 + $0x28] sm:$0xff]   ;;  %s1296_s30 = smov [#allocation10]  }
  0x89   : > { %954 = vmatpush3.bf16.msra.mxu1 %v1084_v5  ;;  %v1080_v11 = vld [vmem:[#allocation5 + $0x30] sm:$0xff]   ;;  %v1088_v12 = vld [vmem:[#allocation7 + $0x20] sm:$0xff]   ;;  %v1081_v13 = vld [vmem:[#allocation5 + $0x38] sm:$0xff]   ;;  %s1218_s9 = sshll.u32 %s1296_s30, 4  ;;  %s1219_s9 = int_to_ptr.vmem [resolvable:$false] %s1218_s9 }
  0x8a   : > { %955 = vmatprep.subr.bf16.mxu1 %v1085_v6  ;;  %v1089_v14 = vld [vmem:[#allocation7 + $0x28] sm:$0xff]   ;;  %v1090_v16 = vld [vmem:[#allocation7 + $0x30] sm:$0xff]   ;;  %v1091_v17 = vld [vmem:[#allocation7 + $0x38] sm:$0xff]   ;;  %s1220_s13 = scalar_lea.vmem %s1219_s9, 1024  ;;  %p1221_p12 = scmp.lt.s32.totalorder %s1575_s21, %s1219_s9 }
  0x8b   : > { %936 = vmatpush3.bf16.msra.mxu0 %v1075_v1  ;;  %v1083_v15 = vld [vmem:[%s1548_s20 + $0x8] sm:$0xff]   ;;  %v1092_v18 = vld [vmem:[#allocation8] sm:$0xff]   ;;  %v1094_v20 = vld [vmem:[#allocation8 + $0x10] sm:$0xff]   ;;  %s1214_s20 = scalar_lea.vmem %s1575_s21, 512 }
  0x8c   : > { %937 = vmatprep.subr.bf16.mxu0 %v1076_v2  ;;  %v1093_v19 = vld [vmem:[#allocation8 + $0x8] sm:$0xff]   ;;  %v1095_v21 = vld [vmem:[#allocation8 + $0x18] sm:$0xff]   ;;  %v1096_v22 = vld [vmem:[#allocation8 + $0x20] sm:$0xff]   ;;  %p1215_p10 = scmp.ne.s32.totalorder %s1575_s21, %s1214_s20  ;;  %p1222_p1 = scmp.lt.s32.totalorder %s1220_s13, %s1214_s20 }
  0x8d   : > { %956 = vmatpush3.bf16.msra.mxu1 %v1085_v6  ;;  %v1097_v23 = vld [vmem:[#allocation8 + $0x28] sm:$0xff]   ;;  %v867_v24 = vld [vmem:[%s1626_s2] ss:$0 sm:$0xff]  ;;  %v1098_v39 = vld [vmem:[#allocation8 + $0x30] sm:$0xff]  }
  0x8e   : > { %957 = vmatprep.subr.bf16.mxu1 %v1086_v8  ;;  %v1099_v40 = vld [vmem:[#allocation8 + $0x38] sm:$0xff]   ;;  %v878_v41 = vld [vmem:[%s1628_s4] ss:$0 sm:$0xff]  ;;  %p1216_p3 = pnand %p1215_p10, %p1493_p5  ;;  %p1223_p2 = por %p1222_p1, %p1221_p12 }
  0x8f   : > { %938 = vmatpush3.bf16.msra.mxu0 %v1076_v2  ;;  %v887_v56 = vld [vmem:[%s1630_s6] ss:$0 sm:$0xff] }
  0x90   : > { %939 = vmatprep.subr.bf16.mxu0 %v1077_v3  ;;  %p1217_p7 = pneg %p1216_p3 }
  0x91   : > { %958 = vmatpush3.bf16.msra.mxu1 %v1086_v8 }
  0x92   : > { %959 = vmatprep.subr.bf16.mxu1 %v1087_v10  ;;  %p1224_p4 = pnand %p1223_p2, %p1217_p7 }
  0x93   : > { %940 = vmatpush3.bf16.msra.mxu0 %v1077_v3 }
  0x94   : > { %941 = vmatprep.subr.bf16.mxu0 %v1078_v7 }
  0x95   : > { %960 = vmatpush3.bf16.msra.mxu1 %v1087_v10 }
  0x96   : > { %961 = vmatprep.subr.bf16.mxu1 %v1088_v12 }
  0x97   : > { %942 = vmatpush3.bf16.msra.mxu0 %v1078_v7 }
  0x98   : > { %943 = vmatprep.subr.bf16.mxu0 %v1079_v9 }
  0x99   : > { %962 = vmatpush3.bf16.msra.mxu1 %v1088_v12 }
  0x9a   : > { %963 = vmatprep.subr.bf16.mxu1 %v1089_v14 }
  0x9b   : > { %944 = vmatpush3.bf16.msra.mxu0 %v1079_v9 }
  0x9c   : > { %945 = vmatprep.subr.bf16.mxu0 %v1080_v11 }
  0x9d   : > { %964 = vmatpush3.bf16.msra.mxu1 %v1089_v14 }
  0x9e   : > { %965 = vmatprep.subr.bf16.mxu1 %v1090_v16 }
  0x9f   : > { %946 = vmatpush3.bf16.msra.mxu0 %v1080_v11 }
  0xa0   : > { %947 = vmatprep.subr.bf16.mxu0 %v1081_v13 }
  0xa1   : > { %966 = vmatpush3.bf16.msra.mxu1 %v1090_v16 }
  0xa2   : > { %967 = vmatprep.subr.bf16.mxu1 %v1091_v17 }
  0xa3   : > { %948 = vmatpush3.bf16.msra.mxu0 %v1081_v13 }
  0xa4   : > { %973 = vmatprep.subr.bf16.mxu0 %v1092_v18 }
  0xa5   : > { %968 = vmatpush3.bf16.msra.mxu1 %v1091_v17 }
  0xa6   : > { %950 = vmatmul.mubr.bf16.vlgmr.msra.gmra.mrb[0].mxu0 %v1083_v15 }
  0xa7   : > { %974 = vmatpush3.bf16.msra.mxu0 %v1092_v18 }
  0xa8   : > { %975 = vmatprep.subr.bf16.mxu0 %v1093_v19 }
  0xab   : > { %976 = vmatpush3.bf16.msra.mxu0 %v1093_v19 }
  0xac   : > { %977 = vmatprep.subr.bf16.mxu0 %v1094_v20 }
  0xaf   : > { %978 = vmatpush3.bf16.msra.mxu0 %v1094_v20 }
  0xb0   : > { %979 = vmatprep.subr.bf16.mxu0 %v1095_v21 }
  0xb3   : > { %980 = vmatpush3.bf16.msra.mxu0 %v1095_v21 }
  0xb4   : > { %981 = vmatprep.subr.bf16.mxu0 %v1096_v22 }
  0xb7   : > { %982 = vmatpush3.bf16.msra.mxu0 %v1096_v22 }
  0xb8   : > { %983 = vmatprep.subr.bf16.mxu0 %v1097_v23 }
  0xbb   : > { %984 = vmatpush3.bf16.msra.mxu0 %v1097_v23 }
  0xbc   : > { %985 = vmatprep.subr.bf16.mxu0 %v1098_v39 }
  0xbf   : > { %986 = vmatpush3.bf16.msra.mxu0 %v1098_v39 }
  0xc0   : > { %987 = vmatprep.subr.bf16.mxu0 %v1099_v40 }
  0xc3   : > { %988 = vmatpush3.bf16.msra.mxu0 %v1099_v40 }
 0x179   : > { %v951_v25 = vpop.f32.mrb[0].mxu0 }
 0x17a   : > { %v474_v26 = vadd.f32 %v951_v25, %v867_v24  ;;  %v465_v27 = vpop.f32.mrb[1].mxu0 }
 0x17b   : > { %v466_v28 = vadd.f32 %v867_v24, %v465_v27  ;;  %v952_v29 = vpop.f32.mrb[2].mxu0 }
 0x17c   : > { %v477_v30 = vadd.f32 %v952_v29, %v867_v24  ;;  %v468_v31 = vpop.f32.mrb[3].mxu0  ;;  %v482_v33 = vmax.f32 %v474_v26, 0.0 }
 0x17d   : > { %v469_v32 = vadd.f32 %v867_v24, %v468_v31  ;;  %v480_v35 = vmax.f32 %v466_v28, 0.0 }
 0x17e   : > { %v483_v34 = vmax.f32 %v477_v30, 0.0 }
 0x17f   : > { %v481_v36 = vmax.f32 %v469_v32, 0.0 }
 0x180   : > { %v485_v37 = vpack.c.bf16 %v483_v34, %v482_v33 }
 0x181   : > { %v484_v38 = vpack.c.bf16 %v481_v36, %v480_v35 }
 0x183   : > { %969 = vmatprep.mubr.bf16.mxu1 %v484_v38 }
 0x184   : > { %970 = vmatmul.mubr.bf16.vlgmr.msra.gmra.mrb[0].mxu1 %v485_v37 }
 0x257   : > { %v971_v42 = vpop.f32.mrb[0].mxu1 }
 0x258   : > { %v600_v43 = vadd.f32 %v971_v42, %v878_v41  ;;  %v591_v44 = vpop.f32.mrb[1].mxu1 }
 0x259   : > { %v592_v45 = vadd.f32 %v878_v41, %v591_v44  ;;  %v972_v46 = vpop.f32.mrb[2].mxu1 }
 0x25a   : > { %v603_v47 = vadd.f32 %v972_v46, %v878_v41  ;;  %v594_v48 = vpop.f32.mrb[3].mxu1  ;;  %v608_v50 = vmax.f32 %v600_v43, 0.0 }
 0x25b   : > { %v595_v49 = vadd.f32 %v878_v41, %v594_v48  ;;  %v606_v52 = vmax.f32 %v592_v45, 0.0 }
 0x25c   : > { %v609_v51 = vmax.f32 %v603_v47, 0.0 }
 0x25d   : > { %v607_v53 = vmax.f32 %v595_v49, 0.0 }
 0x25e   : > { %v611_v54 = vpack.c.bf16 %v609_v51, %v608_v50 }
 0x25f   : > { %v610_v55 = vpack.c.bf16 %v607_v53, %v606_v52 }
 0x261   : > { %989 = vmatprep.mubr.bf16.mxu0 %v610_v55 }
 0x262   : > { %990 = vmatmul.mubr.bf16.vlgmr.msra.gmra.mrb[4].mxu0 %v611_v54 }
 0x335   : > { %v991_v57 = vpop.f32.mrb[4].mxu0 }
 0x336   : > { %v726_v58 = vadd.f32 %v991_v57, %v887_v56  ;;  %v717_v59 = vpop.f32.mrb[5].mxu0 }
 0x337   : > { %v718_v60 = vadd.f32 %v887_v56, %v717_v59  ;;  %v992_v61 = vpop.f32.mrb[6].mxu0 }
 0x338   : > { %734 = vst [vmem:[%s340_s12 + $0x10] sm:$0xff] %v726_v58  ;;  %v729_v62 = vadd.f32 %v992_v61, %v887_v56  ;;  %v720_v63 = vpop.f32.mrb[7].mxu0 }
 0x339   : > { %732 = vst [vmem:[%s340_s12] sm:$0xff] %v718_v60  ;;  %v721_v0 = vadd.f32 %v887_v56, %v720_v63 }
 0x33a   : > { %735 = vst [vmem:[%s340_s12 + $0x18] sm:$0xff] %v729_v62 }
 0x33b   : > { %733 = vst [vmem:[%s340_s12 + $0x8] sm:$0xff] %v721_v0 }
 0x33c   : > { %1227 = shalt.err (!%p1224_p4)
}
 0x33d   : > { %s1228_s15 = scalar_lea.hbm %s1580_s11, 512  ;;  %s1232_s8 = scalar_lea.hbm %s1631_s7, 1024 }
 0x33e   : > { %p1229_p9 = scmp.ne.s32.totalorder %s1580_s11, %s1228_s15  ;;  %p1233_p8 = scmp.lt.u32.totalorder %s1580_s11, %s1631_s7 }
 0x33f   : > { %p1234_p13 = scmp.lt.u32.totalorder %s1232_s8, %s1228_s15  ;;  %p1236_p10 = scmp.lt.u32.totalorder %s1228_s15, %s1580_s11 }
 0x340   : > { %p1230_p0 = pnand %p1229_p9, %p1493_p5 }
 0x341   : > { %p1235_p6 = por %p1234_p13, %p1233_p8 }
 0x342   : > { %p1231_p11 = pneg %p1230_p0 }
 0x343   : > { %p1237_p3 = por %p1236_p10, %p1235_p6 }
 0x345   : > { %p1238_p7 = pnand %p1237_p3, %p1231_p11 }
 0x347   : > { %1241 = shalt.err (!%p1238_p7)
}
 0x348   : > { %s1297_s29 = smov 128   ;;  %s1298_s23 = smov 8  }
 0x349   : > { %1007 = dma.vmem_to_hbm [thread:$0]  (%p1493_p5), %s1575_s21, 512, %s1580_s11, %s737_s28, %s1297_s29, %s1297_s29, %s1298_s23  }
 0x34a PF: > { %s1651_s20 = sld [smem:[#allocation15_spill]]  ;;  %s765_s30 = sand.u32 1, %s1276_s24  }
 0x34b   : > { %p1653_p1 = scmp.ge.s32.totalorder %s1288_s27, 2  ;;  %s766_s9 = scalar_lea.sflag [#allocation4], %s765_s30 }
 0x350   : > { %p1652_p12 = scmp.ne.s32.totalorder %s1651_s20, 0 }
 0x352   : > { %p1024_p2 = pnand %p1653_p1, %p1652_p12 }
 0x354   : > { %1271 = dma.done.wait (!%p1024_p2), %s766_s9, 512  }
 0x355   : > { %1273 = vsyncadd (!%p1024_p2), %s766_s9, 4294966784  ;;  %p22_p4 = scmp.ge.s32.totalorder %s1479_s22, 4   ;;  %s1654_s24 = smov %s1280_s25 }
 0x356   : > { %s1655_s25 = smov %s1284_s26  ;;  %s1656_s26 = smov %s1489_s18 }
 0x357   : > { %s1657_s27 = smov %s1479_s22  ;;  %24 = sbr.rel (!%p22_p4) target bundleno = 7 (0x7), region = 105 }
 0x35e   :  { %771 = vsyncpa [#allocation3], 1 }
 0x35f   :  { %773 = vsyncpa [#allocation3 + $0x1], 1 }
 0x360   :  { %774 = vsyncpa [#allocation6], 1 }
 0x361   :  { %775 = vsyncpa [#allocation9], 1 }
 0x362   :  { %776 = vsyncpa [#allocation4], 1 }
 0x363   :  { %778 = vsyncpa [#allocation4 + $0x1], 1 }

</bundles_post_ra>
